<compile_context>
chip_gen: v6e
topology: v6e:2x2x1
jax: 0.10.0
libtpu: 0.0.40
codegen_flags: <defaults>
</compile_context>

<pallas_src>
import functools
import math

import jax
import jax.numpy as jnp
import numpy as np
from jax.experimental import pallas as pl
from jax.experimental.pallas import tpu as pltpu

_LANES = 128
_VMEM_BUDGET = 48 * 1024 * 1024  # headroom under v7x's 64 MiB physical VMEM


def _sine_embed_kernel(x_ref, scale_ref, phase_ref, o_ref):
    # x_ref:     (TR, P) f32 -- P consecutive logical scalars per physical row
    # scale_ref: (P, L)  f32 -- one-hot row expander pre-multiplied by 1/dim_t
    # phase_ref: (1, L)  f32 -- 0 on sin lanes, pi/2 on cos lanes (0 on pad lanes)
    # o_ref:     (TR, L)     -- lane-dense packed output
    p = x_ref.shape[1]
    if p >= 8:
        # Expansion on the otherwise-idle MXU; frees VALU slots near the sin eval.
        arg = jnp.dot(x_ref[...], scale_ref[...],
                      preferred_element_type=jnp.float32) + phase_ref[...]
    else:
        arg = x_ref[:, 0:1] * scale_ref[0:1, :] + phase_ref[...]
        for q in range(1, p):  # small static unroll (P = 128 // F); pure VPU work
            arg = arg + x_ref[:, q:q + 1] * scale_ref[q:q + 1, :]
    # TODO(synk): confirm in the bundle dump whether jnp.sin lowers to a single
    # EUP op or a VALU range-reduction+polynomial; re-derive the binding unit
    # on v7x (3.2 TB/s HBM) if the latter.
    o_ref[...] = jnp.sin(arg).astype(o_ref.dtype)


def _round_up(a, b):
    return ((a + b - 1) // b) * b


@functools.partial(
    jax.jit,
    static_argnames=("num_pos_feats", "temperature", "tile_rows", "out_dtype"))
def scalar_embedding_sine_1d(x, num_pos_feats=64, temperature=10000.0, *,
                             tile_rows=8192, out_dtype=jnp.float32):
    """x: (N,) float -> (N, num_pos_feats), matching the PyTorch forward.

    out_dtype=jnp.bfloat16 halves HBM writeback (the roofline) if the caller
    can accept bf16 embeddings; default float32 matches the PyTorch module.
    """
    assert num_pos_feats % 2 == 0, "num_pos_feats must be even"
    n = x.shape[0]
    f = int(num_pos_feats)
    out_itemsize = int(np.dtype(out_dtype).itemsize)

    # Lane packing: fold P logical rows into one 128-lane row when possible,
    # otherwise pad lanes up to a multiple of 128 (full-lane unmasked stores).
    if f < _LANES and _LANES % f == 0:
        p, lanes = _LANES // f, _LANES
    else:
        p, lanes = 1, _round_up(f, _LANES)
    valid_cols = p * f  # == lanes unless we padded columns (p == 1 path)

    # ---- host-side (plain JAX) constants, resident across all grid steps ----
    i = jnp.arange(f, dtype=jnp.float32)
    dim_t = jnp.asarray(temperature, jnp.float32) ** (2.0 * jnp.trunc(i / 2.0) / f)
    inv_dimt = 1.0 / dim_t                               # multiply in-kernel, not divide
    j = jnp.arange(lanes)
    jmod = j % f
    valid = j < valid_cols
    inv_wide = jnp.where(valid, inv_dimt[jmod], 0.0)     # (lanes,)
    # scale[q, l] = 1/dim_t[l % f] if (l // f) == q else 0   (one-hot expander)
    sel = ((j // f)[None, :] == jnp.arange(p)[:, None]) & valid[None, :]
    scale = jnp.where(sel, inv_wide[None, :], 0.0).astype(jnp.float32)   # (p, lanes)
    # cos(t) == sin(t + pi/2): odd feature lanes get a pi/2 phase offset
    phase = jnp.where(valid, (jmod % 2).astype(jnp.float32) * (math.pi / 2.0),
                      0.0).reshape(1, lanes).astype(jnp.float32)

    # ---- tile sizing: big tiles, >=2 grid steps for moderate N, VMEM budget ----
    rows = -(-n // p)                                        # ceil(n / p)
    tr = min(_round_up(max(8, tile_rows), 8),
             _round_up(max(1, -(-rows // 2)), 8))            # >=2 steps (v7x 2 TCs)
    tr = max(8, tr)

    def vmem_needed(t):
        # x block is lane-padded to 128 lanes in VMEM -> t*512 B per buffer.
        x_buf = t * _LANES * 4
        o_buf = t * lanes * out_itemsize
        consts = 4 * 8 * lanes * 4                           # scale+phase, dbl-buffered
        return 2 * x_buf + 2 * o_buf + consts

    while tr > 8 and vmem_needed(tr) > _VMEM_BUDGET:
        tr = max(8, _round_up(tr // 2, 8))

    rows_pad = _round_up(rows, tr)
    n_pad = rows_pad * p
    grid = rows_pad // tr

    # ---- pack + pad x (sublane dim of every block is a multiple of 8) ----
    xf = x.astype(jnp.float32).reshape(-1)
    if n_pad != n:
        xf = jnp.pad(xf, (0, n_pad - n))
    x_pack = xf.reshape(rows_pad, p)

    cost = pl.CostEstimate(
        flops=int(2 * rows_pad * lanes * p),
        transcendentals=int(rows_pad * lanes),
        bytes_accessed=int(rows_pad * lanes * out_itemsize + n_pad * 4),
    )

    out_pack = pl.pallas_call(
        _sine_embed_kernel,
        out_shape=jax.ShapeDtypeStruct((rows_pad, lanes), out_dtype),
        grid=(grid,),
        in_specs=[
            pl.BlockSpec((tr, p), lambda r: (r, 0)),         # x tile marches over rows
            pl.BlockSpec((p, lanes), lambda r: (0, 0)),      # constants stay resident
            pl.BlockSpec((1, lanes), lambda r: (0, 0)),
        ],
        out_specs=pl.BlockSpec((tr, lanes), lambda r: (r, 0)),
        compiler_params=pltpu.CompilerParams(
            dimension_semantics=("parallel",),               # shard rows across TCs (v7x)
            vmem_limit_bytes=int(min(56 << 20,
                                     max(32 << 20, vmem_needed(tr) + (4 << 20)))),
        ),
        cost_estimate=cost,
    )(x_pack, scale, phase)

    # Unpack lane-dense rows back to the logical (N, F) layout.  Under jit the
    # reshape/slice fuse with the consumer and are no-ops when nothing was padded.
    if p > 1:
        out = out_pack.reshape(n_pad, f)
        return out[:n] if n_pad != n else out
    out = out_pack[:, :f] if lanes != f else out_pack
    return out[:n] if rows_pad != n else out


def _reference(x, num_pos_feats=64, temperature=10000.0):
    f = num_pos_feats
    i = jnp.arange(f, dtype=jnp.float32)
    dim_t = jnp.asarray(temperature, jnp.float32) ** (2.0 * jnp.trunc(i / 2.0) / f)
    pos = x[:, None] / dim_t[None, :]
    sin_part = jnp.sin(pos[:, 0::2])
    cos_part = jnp.cos(pos[:, 1::2])
    return jnp.stack((sin_part, cos_part), axis=2).reshape(x.shape[0], f)


if __name__ == "__main__":
    key = jax.random.PRNGKey(0)
    num_pos_feats = 64  # module default

    # Primary small example (single tile, packed-lane path P=2).
    n = 8
    x = jax.random.uniform(key, (n,), dtype=jnp.float32) * 100.0
    out = jax.block_until_ready(scalar_embedding_sine_1d(x, num_pos_feats=num_pos_feats))
    ref = _reference(x, num_pos_feats=num_pos_feats)
    assert out.shape == (n, num_pos_feats)
    assert jnp.allclose(out, ref, atol=2e-4, rtol=1e-5)

    # Multi-step grid + row padding (non-multiple-of-tile N, small tile).
    n2 = 777
    x2 = jax.random.uniform(jax.random.PRNGKey(0), (n2,), dtype=jnp.float32) * 100.0
    out2 = jax.block_until_ready(
        scalar_embedding_sine_1d(x2, num_pos_feats=num_pos_feats, tile_rows=64))
    ref2 = _reference(x2, num_pos_feats=num_pos_feats)
    assert out2.shape == (n2, num_pos_feats)
    assert jnp.allclose(out2, ref2, atol=2e-4, rtol=1e-5)

    # Lane-padding fallback: F that does not divide 128 (P=1, padded columns).
    n3 = 33
    x3 = jax.random.uniform(jax.random.PRNGKey(1), (n3,), dtype=jnp.float32) * 10.0
    out3 = jax.block_until_ready(scalar_embedding_sine_1d(x3, num_pos_feats=40))
    ref3 = _reference(x3, num_pos_feats=40)
    assert out3.shape == (n3, 40)
    assert jnp.allclose(out3, ref3, atol=2e-4, rtol=1e-5)

    # bf16 output option (halved HBM writeback); looser tolerance for bf16.
    out4 = jax.block_until_ready(
        scalar_embedding_sine_1d(x, num_pos_feats=num_pos_feats, out_dtype=jnp.bfloat16))
    assert out4.dtype == jnp.bfloat16
    assert jnp.allclose(out4.astype(jnp.float32), ref, atol=2e-2, rtol=1e-2)

    print("KERNEL_OK")
</pallas_src>

<mosaic_0001>
module attributes {stable_mosaic.version = 11 : i64} {
  func.func @_sine_embed_kernel(%arg0: i32, %arg1: memref<8x2xf32, #tpu.memory_space<vmem>>, %arg2: memref<2x128xf32, #tpu.memory_space<vmem>>, %arg3: memref<1x128xf32, #tpu.memory_space<vmem>>, %arg4: memref<8x128xf32, #tpu.memory_space<vmem>>) attributes {dimension_semantics = [#tpu.dimension_semantics<parallel>], iteration_bounds = array<i64: 1>, scalar_prefetch = 0 : i64, scratch_operands = 0 : i64, tpu.core_type = #tpu.core_type<tc>, window_params = [{transform_indices = @transform_0, window_bounds = array<i64: 8, 2>}, {pipeline_mode = #tpu.pipeline_mode<synchronous>, transform_indices = @transform_1, window_bounds = array<i64: 2, 128>}, {pipeline_mode = #tpu.pipeline_mode<synchronous>, transform_indices = @transform_2, window_bounds = array<i64: 1, 128>}, {transform_indices = @transform_3, window_bounds = array<i64: 8, 128>}]} {
    %c0 = arith.constant 0 : index
    %c0_0 = arith.constant 0 : index
    %0 = vector.load %arg1[%c0, %c0_0] : memref<8x2xf32, #tpu.memory_space<vmem>>, vector<8x1xf32>
    %c0_1 = arith.constant 0 : index
    %c0_2 = arith.constant 0 : index
    %1 = vector.load %arg2[%c0_1, %c0_2] : memref<2x128xf32, #tpu.memory_space<vmem>>, vector<1x128xf32>
    %2 = vector.broadcast %0 : vector<8x1xf32> to vector<8x128xf32>
    %3 = vector.broadcast %1 : vector<1x128xf32> to vector<8x128xf32>
    %4 = arith.mulf %2, %3 : vector<8x128xf32>
    %c0_3 = arith.constant 0 : index
    %c0_4 = arith.constant 0 : index
    %5 = vector.load %arg3[%c0_3, %c0_4] : memref<1x128xf32, #tpu.memory_space<vmem>>, vector<1x128xf32>
    %6 = vector.broadcast %5 : vector<1x128xf32> to vector<8x128xf32>
    %7 = arith.addf %4, %6 : vector<8x128xf32>
    %c0_5 = arith.constant 0 : index
    %c1 = arith.constant 1 : index
    %8 = vector.load %arg1[%c0_5, %c1] : memref<8x2xf32, #tpu.memory_space<vmem>>, vector<8x1xf32>
    %c1_6 = arith.constant 1 : index
    %c0_7 = arith.constant 0 : index
    %9 = vector.load %arg2[%c1_6, %c0_7] : memref<2x128xf32, #tpu.memory_space<vmem>>, vector<1x128xf32>
    %10 = vector.broadcast %8 : vector<8x1xf32> to vector<8x128xf32>
    %11 = vector.broadcast %9 : vector<1x128xf32> to vector<8x128xf32>
    %12 = arith.mulf %10, %11 : vector<8x128xf32>
    %13 = arith.addf %7, %12 : vector<8x128xf32>
    %14 = math.sin %13 : vector<8x128xf32>
    %c0_8 = arith.constant 0 : index
    %c0_9 = arith.constant 0 : index
    %15 = vector.load %arg4[%c0_8, %c0_9] : memref<8x128xf32, #tpu.memory_space<vmem>>, vector<8x128xf32>
    tpu.vector_store %arg4[%c0_8, %c0_9], %14 {strides = array<i32>} : memref<8x128xf32, #tpu.memory_space<vmem>>, vector<8x128xf32>,
    return
  }
  func.func @transform_0(%arg0: i32) -> (i32, i32) {
    %c0_i32 = arith.constant 0 : i32
    %c0_i32_0 = arith.constant 0 : i32
    return %arg0, %c0_i32 : i32, i32
  }
  func.func @transform_1(%arg0: i32) -> (i32, i32) {
    %c0_i32 = arith.constant 0 : i32
    %c0_i32_0 = arith.constant 0 : i32
    %c0_i32_1 = arith.constant 0 : i32
    return %c0_i32, %c0_i32_0 : i32, i32
  }
  func.func @transform_2(%arg0: i32) -> (i32, i32) {
    %c0_i32 = arith.constant 0 : i32
    %c0_i32_0 = arith.constant 0 : i32
    %c0_i32_1 = arith.constant 0 : i32
    return %c0_i32, %c0_i32_0 : i32, i32
  }
  func.func @transform_3(%arg0: i32) -> (i32, i32) {
    %c0_i32 = arith.constant 0 : i32
    %c0_i32_0 = arith.constant 0 : i32
    return %arg0, %c0_i32 : i32, i32
  }
}

</mosaic_0001>

<bundles_post_ra>
// kernel: scalar_embedding_sine_1d.1
= control target key start
LH: loop header
LB: loop body
LE: loop exit
PB: predicated region body
PF: predicated region fallthrough
CT: control target
= control target key end

     0   :  { %v179_v0 = vmov 0   ;;  %v180_v2 = vmov 1   ;;  %v181_v22 = vmov 683565275   ;;  %v182_v24 = vmov 2475754826   ;;  %s243_s0 = inlined_call_operand.vmem [shape: f32[8,2], index: 0, kind: input, shape index: {}]   ;;  %s244_s1 = inlined_call_operand.vmem [shape: f32[2,128], index: 1, kind: input, shape index: {}]   ;;  %s245_s2 = inlined_call_operand.vmem [shape: f32[1,128], index: 2, kind: input, shape index: {}]   ;;  %s246_s3 = inlined_call_operand.vmem [shape: f32[8,128], index: 3, kind: output, shape index: {}]  }
   0x1   :  { %173 = vset.pattern.permute.xlu0 %v179_v0  ;;  %v14_v1 = vld [vmem:[%s243_s0] sm:$0xff]  ;;  %v183_v27 = vmov 2131351028   ;;  %v184_v30 = vmov 2102212464  }
   0x2   :  { %18 = vperm.xlu0 %173, %v14_v1   ;;  %v154_v3 = vld [vmem:[%s244_s1] ss:$0 sm:$0xff]  ;;  %v156_v7 = vld [vmem:[%s244_s1 + $0x1] ss:$0 sm:$0xff]  ;;  %v185_v33 = vmov 920167782  }
   0x3   :  { %v155_v6 = vld [vmem:[%s245_s2] ss:$0 sm:$0xff]  ;;  %v186_v36 = vmov 1326507024  }
   0x6   :  { %174 = vset.pattern.permute.xlu0 %v180_v2 }
   0x7   :  { %36 = vperm.xlu0 %174, %v14_v1  }
  0x7d   :  { %v19_v4 = vpop.permute.xlu0 %18 }
  0x7e   :  { %v25_v5 = vmul.f32 %v154_v3, %v19_v4 }
  0x80   :  { %v33_v9 = vadd.f32 %v155_v6, %v25_v5 }
  0x82   :  { %v37_v8 = vpop.permute.xlu0 %36 }
  0x83   :  { %v43_v10 = vmul.f32 %v156_v7, %v37_v8 }
  0x85   :  { %v219_v11 = vadd.f32 %v43_v10, %v33_v9 }
  0x87   :  { %v48_v12 = vand.u32 2139095040, %v219_v11  ;;  %v45_v16 = vand.u32 2147483647, %v219_v11  ;;  %vm47_vm7 = vcmp.lt.s32.totalorder %v219_v11, 0  ;;  %vm137_vm12 = vweird.f32 %v219_v11 }
  0x89   :  { %v49_v13 = vshrl.u32 %v48_v12, 23  ;;  %v52_v19 = vand.u32 8388607, %v45_v16  ;;  %vm46_vm8 = vcmp.le.f32.partialorder %v45_v16, 0.7853982 }
  0x8b   :  { %v157_v14 = vadd.s32 4294967169, %v49_v13  ;;  %v53_v38 = vor.u32 8388608, %v52_v19 }
  0x8d   :  { %v55_v15 = vadd.s32 1, %v157_v14  ;;  %v93_v52 = vshll.u32 %v53_v38, 8 }
  0x8f   :  { %vm56_vm0 = vcmp.gt.s32.totalorder %v55_v15, 0 }
  0x90   :  { %v57_v17 = vsel %vm56_vm0, %v55_v15, 0 }
  0x91   :  { %v59_v18 = vand.u32 31, %v57_v17  ;;  %v58_v21 = vshrl.u32 %v57_v17, 5 }
  0x93   :  { %v60_v20 = vsub.s32 32, %v59_v18  ;;  %v62_v23 = vshll.u32 %v181_v22, %v59_v18  ;;  %v65_v25 = vshll.u32 %v182_v24, %v59_v18  ;;  %v68_v29 = vshll.u32 %v183_v27, %v59_v18 }
  0x94   :  { %v71_v32 = vshll.u32 %v184_v30, %v59_v18  ;;  %v74_v35 = vshll.u32 %v185_v33, %v59_v18  ;;  %vm77_vm1 = vcmp.lt.s32.totalorder %v58_v21, 1  ;;  %vm80_vm2 = vcmp.lt.s32.totalorder %v58_v21, 4 }
  0x95   :  { %v63_v26 = vshrl.u32 %v182_v24, %v60_v20  ;;  %v66_v28 = vshrl.u32 %v183_v27, %v60_v20  ;;  %v69_v31 = vshrl.u32 %v184_v30, %v60_v20  ;;  %v72_v34 = vshrl.u32 %v185_v33, %v60_v20 }
  0x96   :  { %v75_v37 = vshrl.u32 %v186_v36, %v60_v20  ;;  %v61_v47 = vshrl.u32 %v181_v22, %v60_v20  ;;  %vm79_vm3 = vcmp.lt.s32.totalorder %v58_v21, 3  ;;  %vm78_vm4 = vcmp.lt.s32.totalorder %v58_v21, 2 }
  0x97   :  { %v64_v39 = vor.u32 %v63_v26, %v62_v23  ;;  %v67_v40 = vor.u32 %v66_v28, %v65_v25  ;;  %v70_v41 = vor.u32 %v69_v31, %v68_v29  ;;  %v73_v42 = vor.u32 %v72_v34, %v71_v32 }
  0x98   :  { %v76_v43 = vor.u32 %v75_v37, %v74_v35 }
  0x99   :  { %v82_v44 = vsel %vm80_vm2, %v70_v41, 2102212464  ;;  %v85_v45 = vsel %vm77_vm1, %v64_v39, %v67_v40  ;;  %v89_v46 = vsel %vm77_vm1, %v67_v40, %v70_v41  ;;  %v86_v48 = vsel %vm80_vm2, %v73_v42, 920167782 }
  0x9a   :  { %v90_v49 = vsel %vm80_vm2, %v76_v43, 1326507024  ;;  %v87_v50 = vsel %vm79_vm3, %v70_v41, %v86_v48  ;;  %v81_v53 = vsel %vm77_vm1, %v61_v47, %v64_v39  ;;  %v83_v54 = vsel %vm79_vm3, %v67_v40, %v82_v44 }
  0x9b   :  { %v91_v51 = vsel %vm79_vm3, %v73_v42, %v90_v49  ;;  %v88_v55 = vsel %vm78_vm4, %v85_v45, %v87_v50  ;;  %v84_v61 = vsel %vm78_vm4, %v81_v53, %v83_v54 }
  0x9c   :  { %v92_v56 = vsel %vm78_vm4, %v89_v46, %v91_v51  ;;  %v228_v59 = vmul.u32.u64.low %v93_v52, %v88_v55  ;;  %v229_v60 = vmul.u32.u64.high %v93_v52, %v88_v55, %v228_v59  ;;  %v100_v63 = vmul.u32 %v93_v52, %v84_v61 }
  0x9d   :  { %v225_v57 = vmul.u32.u64.low %v93_v52, %v92_v56  ;;  %v226_v58 = vmul.u32.u64.high %v93_v52, %v92_v56, %v225_v57 }
  0x9e   :  { %v103_v62 = vadd.s32 1, %v229_v60 }
  0x9f   :  { %vm102_vm5 = vc.u32 %v226_v58, %v228_v59  ;;  %v101_v12 = vadd.s32 %v228_v59, %v226_v58 }
  0xa0   :  { %v104_v0 = vsel %vm102_vm5, %v103_v62, %v229_v60 }
  0xa1   :  { %v105_v1 = vadd.s32 %v104_v0, %v100_v63 }
  0xa3   :  { %v106_v2 = vadd.s32 536870912, %v105_v1 }
  0xa5   :  { %v107_v3 = vshrl.u32 %v106_v2, 30 }
  0xa7   :  { %v108_v4 = vshll.u32 %v107_v3, 30  ;;  %v131_v26 = vsub.s32 4, %v107_v3 }
  0xa9   :  { %v109_v5 = vsub.s32 %v105_v1, %v108_v4  ;;  %v132_v29 = vsel %vm47_vm7, %v131_v26, %v107_v3 }
  0xaa   :  { %v134_v30 = vsel %vm46_vm8, 0, %v132_v29 }
  0xab   :  { %v111_v6 = vsub.s32 0, %v109_v5  ;;  %v138_v31 = vadd.s32 3, %v134_v30 }
  0xad   :  { %v158_v7 = vmin.u32 %v111_v6, %v109_v5  ;;  %v139_v32 = vand.u32 3, %v138_v31 }
  0xaf   :  { %v113_v8 = vclz %v158_v7  ;;  %vm144_vm9 = vcmp.eq.s32.totalorder %v139_v32, 2  ;;  %vm141_vm10 = vcmp.eq.s32.totalorder %v139_v32, 0  ;;  %vm140_vm11 = vcmp.lt.s32.totalorder %v139_v32, 2 }
  0xb1   :  { %v159_v9 = vadd.s32 4294967294, %v113_v8 }
  0xb3   :  { %vm160_vm6 = vcmp.lt.s32.totalorder %v159_v9, 0 }
  0xb4   :  { %v116_v10 = vsel %vm160_vm6, 0, %v159_v9 }
  0xb5   :  { %v117_v13 = vsub.s32 32, %v116_v10  ;;  %v121_v14 = vsub.s32 4294967266, %v116_v10  ;;  %v118_v15 = vshll.u32 %v109_v5, %v116_v10 }
  0xb7   :  { %v119_v17 = vshrl.u32 %v101_v12, %v117_v13  ;;  %v122_v18 = vadd.s32 127, %v121_v14 }
  0xb9   :  { %v120_v19 = vor.u32 %v119_v17, %v118_v15  ;;  %v123_v20 = vshll.u32 %v122_v18, 23 }
  0xbb   :  { %v124_v21 = vor.u32 4788187, %v123_v20  ;;  %v127_v23 = vcvt.s32.f32 %v120_v19 }
  0xbd   :  { %v125_v22 = vand.u32 2147483647, %v124_v21 }
  0xbf   :  { %v128_v24 = vmul.f32 %v127_v23, %v125_v22 }
  0xc1   :  { %v129_v25 = vxor.u32 2147483648, %v128_v24 }
  0xc3   :  { %v130_v27 = vsel %vm47_vm7, %v129_v25, %v128_v24 }
  0xc4   :  { %v133_v28 = vsel %vm46_vm8, %v219_v11, %v130_v27 }
  0xc5   :  { %175 = vcosq.f32 %v133_v28 }
  0xc6   :  { %177 = vsinq.f32 %v133_v28 }
  0xd2   :  { %v176_v33 = vpop.eup %175 }
  0xd3   :  { %v178_v34 = vpop.eup %177  ;;  %v145_v35 = vxor.u32 2147483648, %v176_v33 }
  0xd4   :  { %v142_v36 = vxor.u32 2147483648, %v178_v34 }
  0xd5   :  { %v146_v37 = vsel %vm144_vm9, %v145_v35, %v178_v34 }
  0xd6   :  { %v143_v38 = vsel %vm141_vm10, %v176_v33, %v142_v36 }
  0xd7   :  { %v147_v16 = vsel %vm140_vm11, %v143_v38, %v146_v37 }
  0xd8   :  { %v148_v39 = vsel %vm137_vm12, nan, %v147_v16 }
  0xd9   :  { %149 = vst [vmem:[%s246_s3] sm:$0xff] %v148_v39 }

</bundles_post_ra>
